<compile_context>
chip_gen: v5e
topology: v5e:2x2
jax: 0.10.0
libtpu: 0.0.40
codegen_flags: <defaults>
</compile_context>

<pallas_src>
import math

import jax
import jax.numpy as jnp
from jax.experimental import pallas as pl
from jax.experimental.pallas import tpu as pltpu


def _round_up(x, m):
    return ((x + m - 1) // m) * m


def _cdiv(a, b):
    return (a + b - 1) // b


def _vmem_capacity_bytes():
    # Per-generation physical VMEM (128 MiB on v5e/v6e, 64 MiB per TC on v7x).
    try:
        return int(pltpu.get_tpu_info().vmem_capacity_bytes)
    except Exception:
        return 64 << 20  # conservative fallback, valid on every generation


# ---------------------------------------------------------------------------
# Kernel body: fully fused 3 matmuls + bias + ReLU on one row tile.
# ---------------------------------------------------------------------------
def _mlp_kernel(x_ref, w1_ref, b1_ref, w2_ref, b2_ref, w3_ref, b3_ref, o_ref):
    cdt = w1_ref.dtype                        # MXU operand dtype (f32 or bf16)
    x = x_ref[...].astype(cdt)                # cast tile in-kernel (no wrapper copy)
    h1 = jnp.dot(x, w1_ref[...], preferred_element_type=jnp.float32) + b1_ref[...]
    h1 = jnp.maximum(h1, 0.0)
    h2 = jnp.dot(h1.astype(cdt), w2_ref[...], preferred_element_type=jnp.float32) + b2_ref[...]
    h2 = jnp.maximum(h2, 0.0)
    y = jnp.dot(h2.astype(cdt), w3_ref[...], preferred_element_type=jnp.float32) + b3_ref[...]
    o_ref[...] = y.astype(o_ref.dtype)


# ---------------------------------------------------------------------------
# One-time parameter preparation (pad + cast).  Call once, reuse every forward.
# Zero padding is exact for this MLP: padded weight rows/cols and biases are 0
# and relu(0)=0, so padded lanes carry zeros through every layer and are
# stripped (or never materialized) at the end.
# ---------------------------------------------------------------------------
def prepare_params(params, compute_dtype=jnp.float32):
    w1, b1 = params["w1"], params["b1"]
    w2, b2 = params["w2"], params["b2"]
    w3, b3 = params["w3"], params["b3"]
    d, h = w1.shape
    assert w2.shape == (h, h) and w3.shape == (h, d)
    compute_dtype = jnp.dtype(compute_dtype)

    hp = _round_up(max(h, 128), 128)          # hidden, lane-dense
    dp = _round_up(max(d, 128), 128)          # output features, lane-dense

    def pad2(a, rows, cols, dtype):
        a = jnp.asarray(a).reshape(-1, a.shape[-1]).astype(dtype)
        pr, pc = rows - a.shape[0], cols - a.shape[1]
        if pr or pc:
            a = jnp.pad(a, ((0, pr), (0, pc)))
        return a

    return {
        # w1 keeps its input dim at d so the kernel contracts against RAW x.
        "w1": pad2(w1, d, hp, compute_dtype),
        "b1": pad2(b1, 1, hp, jnp.float32),
        "w2": pad2(w2, hp, hp, compute_dtype),
        "b2": pad2(b2, 1, hp, jnp.float32),
        "w3": pad2(w3, hp, dp, compute_dtype),
        "b3": pad2(b3, 1, dp, jnp.float32),
        "meta": (d, h, hp, dp, compute_dtype),
    }


# ---------------------------------------------------------------------------
# Forward pass.
# ---------------------------------------------------------------------------
def adaptive_prototypical_forward(x, prepared, *, block_rows=None):
    """Fused 3-layer MLP (fc1 -> relu -> fc2 -> relu -> fc3) Pallas kernel.

    x:        (N, feature_dim), any float dtype (stays un-padded / un-cast).
    prepared: output of prepare_params(params, compute_dtype).
    """
    d, h, hp, dp, cdt = prepared["meta"]
    n, dx = x.shape
    assert dx == d, f"feature_dim mismatch: {dx} vs {d}"
    out_dtype = x.dtype

    vmem_cap = _vmem_capacity_bytes()
    wb = cdt.itemsize
    weight_bytes = (d * hp + hp * hp + hp * dp) * wb + (2 * hp + dp) * 4

    def vmem_estimate(br):
        # Weights/biases are grid-invariant but still double-buffered by the
        # BlockSpec pipeline; x/out row tiles are double-buffered; h1/h2 are
        # f32 intermediates; plus compiler scratch headroom.
        return (2 * weight_bytes
                + 2 * br * d * jnp.dtype(x.dtype).itemsize
                + 2 * br * dp * jnp.dtype(out_dtype).itemsize
                + 2 * br * hp * 4
                + (4 << 20))

    if block_rows is None:
        # Biggest row tile the generation comfortably supports, balanced across
        # >= 2 grid steps so the single "parallel" axis can shard over both
        # TensorCores on v7x and the pipeline has something to overlap.
        max_rows = 1024 if vmem_cap >= (96 << 20) else 512
        num_tiles = max(2, _cdiv(n, max_rows))
        block_rows = min(_round_up(_cdiv(n, num_tiles), 8), _round_up(n, 8))
    block_rows = max(8, _round_up(block_rows, 8))
    # Shrink the row tile if the estimated footprint exceeds physical VMEM.
    while block_rows > 8 and vmem_estimate(block_rows) > vmem_cap:
        block_rows = max(8, _round_up(block_rows // 2, 8))
    # TODO(synk): for very large hidden sizes (e.g. f32 H>=2048 on v7x) whole-weight
    # residency no longer fits 64 MiB VMEM; a K-tiled fallback (grid axis over H +
    # VMEM accumulator) and single-buffering of the grid-invariant weight specs
    # (pl.Buffered(1)) would be needed — not required at these shapes.

    grid = (_cdiv(n, block_rows),)
    vmem_limit = int(min(max(vmem_estimate(block_rows), 32 << 20), vmem_cap))

    cost = pl.CostEstimate(
        flops=2 * n * (d * hp + hp * hp + hp * dp),
        transcendentals=0,
        bytes_accessed=(n * d * jnp.dtype(x.dtype).itemsize
                        + weight_bytes
                        + n * dp * jnp.dtype(out_dtype).itemsize),
    )

    out = pl.pallas_call(
        _mlp_kernel,
        out_shape=jax.ShapeDtypeStruct((n, dp), out_dtype),
        grid_spec=pltpu.PrefetchScalarGridSpec(
            num_scalar_prefetch=0,
            grid=grid,
            in_specs=[
                pl.BlockSpec((block_rows, d), lambda i: (i, 0)),  # x row tile (raw)
                pl.BlockSpec((d, hp), lambda i: (0, 0)),          # w1 (resident)
                pl.BlockSpec((1, hp), lambda i: (0, 0)),          # b1
                pl.BlockSpec((hp, hp), lambda i: (0, 0)),         # w2
                pl.BlockSpec((1, hp), lambda i: (0, 0)),          # b2
                pl.BlockSpec((hp, dp), lambda i: (0, 0)),         # w3
                pl.BlockSpec((1, dp), lambda i: (0, 0)),          # b3
            ],
            out_specs=pl.BlockSpec((block_rows, dp), lambda i: (i, 0)),
        ),
        compiler_params=pltpu.CompilerParams(
            dimension_semantics=("parallel",),   # rows independent -> megacore shards
            vmem_limit_bytes=vmem_limit,
        ),
        cost_estimate=cost,
    )(x, prepared["w1"], prepared["b1"], prepared["w2"], prepared["b2"],
      prepared["w3"], prepared["b3"])

    # Rows already match n (ragged edge-block OOB writes are discarded); only
    # lane-padded feature columns need stripping, and only when d % 128 != 0.
    if dp != d:
        out = out[:, :d]
    return out


# ---------------------------------------------------------------------------
# Init / reference.
# ---------------------------------------------------------------------------
def init_params(key, feature_dim, hidden_size):
    """nn.Linear default init: U(-1/sqrt(fan_in), 1/sqrt(fan_in)).

    Weights are stored transposed, i.e. (in_features, out_features)."""
    keys = jax.random.split(key, 6)

    def linear_init(kw, kb, fan_in, fan_out):
        bound = 1.0 / math.sqrt(fan_in)
        w = jax.random.uniform(kw, (fan_in, fan_out), jnp.float32, -bound, bound)
        b = jax.random.uniform(kb, (1, fan_out), jnp.float32, -bound, bound)
        return w, b

    w1, b1 = linear_init(keys[0], keys[1], feature_dim, hidden_size)
    w2, b2 = linear_init(keys[2], keys[3], hidden_size, hidden_size)
    w3, b3 = linear_init(keys[4], keys[5], hidden_size, feature_dim)
    return {"w1": w1, "b1": b1, "w2": w2, "b2": b2, "w3": w3, "b3": b3}


def reference_forward(x, params):
    h1 = jnp.maximum(x @ params["w1"] + params["b1"], 0.0)
    h2 = jnp.maximum(h1 @ params["w2"] + params["b2"], 0.0)
    return h2 @ params["w3"] + params["b3"]


if __name__ == "__main__":
    # Small shapes consistent with the module's forward: x is (N, feature_dim).
    N, FEATURE_DIM, HIDDEN = 8, 64, 32

    key = jax.random.PRNGKey(0)
    k_params, k_x, k_x2 = jax.random.split(key, 3)
    params = init_params(k_params, FEATURE_DIM, HIDDEN)

    # Pad/cast weights ONCE; reuse across calls (review item #1).
    prepared_f32 = prepare_params(params, compute_dtype=jnp.float32)

    # 1) Default f32 path.
    x = jax.random.normal(k_x, (N, FEATURE_DIM), dtype=jnp.float32)
    y = jax.block_until_ready(adaptive_prototypical_forward(x, prepared_f32))
    y_ref = reference_forward(x, params)
    assert y.shape == (N, FEATURE_DIM)
    assert jnp.allclose(y, y_ref, atol=1e-5, rtol=1e-5)

    # 2) Ragged multi-step "parallel" row grid (40 rows, 16-row tiles, edge masked).
    N2 = 40
    x2 = jax.random.normal(k_x2, (N2, FEATURE_DIM), dtype=jnp.float32)
    y2 = jax.block_until_ready(
        adaptive_prototypical_forward(x2, prepared_f32, block_rows=16))
    assert y2.shape == (N2, FEATURE_DIM)
    assert jnp.allclose(y2, reference_forward(x2, params), atol=1e-5, rtol=1e-5)

    # 3) bf16 operand path (f32 accumulation) — v6e/v7x MXU peak; looser tolerance.
    prepared_bf16 = prepare_params(params, compute_dtype=jnp.bfloat16)
    y_bf16 = jax.block_until_ready(
        adaptive_prototypical_forward(x, prepared_bf16))
    assert jnp.allclose(y_bf16, y_ref, atol=1e-1, rtol=1e-1)

    print("KERNEL_OK")
</pallas_src>

<mosaic_0001>
module attributes {stable_mosaic.version = 11 : i64} {
  func.func @_mlp_kernel(%arg0: i32, %arg1: memref<8x64xf32, #tpu.memory_space<vmem>>, %arg2: memref<64x128xf32, #tpu.memory_space<vmem>>, %arg3: memref<1x128xf32, #tpu.memory_space<vmem>>, %arg4: memref<128x128xf32, #tpu.memory_space<vmem>>, %arg5: memref<1x128xf32, #tpu.memory_space<vmem>>, %arg6: memref<128x128xf32, #tpu.memory_space<vmem>>, %arg7: memref<1x128xf32, #tpu.memory_space<vmem>>, %arg8: memref<8x128xf32, #tpu.memory_space<vmem>>) attributes {dimension_semantics = [#tpu.dimension_semantics<parallel>], iteration_bounds = array<i64: 1>, scalar_prefetch = 0 : i64, scratch_operands = 0 : i64, tpu.core_type = #tpu.core_type<tc>, window_params = [{transform_indices = @transform_0, window_bounds = array<i64: 8, 64>}, {pipeline_mode = #tpu.pipeline_mode<synchronous>, transform_indices = @transform_1, window_bounds = array<i64: 64, 128>}, {pipeline_mode = #tpu.pipeline_mode<synchronous>, transform_indices = @transform_2, window_bounds = array<i64: 1, 128>}, {pipeline_mode = #tpu.pipeline_mode<synchronous>, transform_indices = @transform_3, window_bounds = array<i64: 128, 128>}, {pipeline_mode = #tpu.pipeline_mode<synchronous>, transform_indices = @transform_4, window_bounds = array<i64: 1, 128>}, {pipeline_mode = #tpu.pipeline_mode<synchronous>, transform_indices = @transform_5, window_bounds = array<i64: 128, 128>}, {pipeline_mode = #tpu.pipeline_mode<synchronous>, transform_indices = @transform_6, window_bounds = array<i64: 1, 128>}, {transform_indices = @transform_7, window_bounds = array<i64: 8, 128>}]} {
    %c0 = arith.constant 0 : index
    %c0_0 = arith.constant 0 : index
    %0 = vector.load %arg1[%c0, %c0_0] : memref<8x64xf32, #tpu.memory_space<vmem>>, vector<8x64xf32>
    %c0_1 = arith.constant 0 : index
    %c0_2 = arith.constant 0 : index
    %1 = vector.load %arg2[%c0_1, %c0_2] : memref<64x128xf32, #tpu.memory_space<vmem>>, vector<64x128xf32>
    %cst = arith.constant dense<0.000000e+00> : vector<8x128xf32>
    %2 = tpu.matmul %0, %1, %cst {dimension_numbers = #tpu.dot_dimension_numbers<[1], [0], [0], [1], [0, 0, 1, 1], [], []>} : vector<8x64xf32>, vector<64x128xf32>, vector<8x128xf32> -> vector<8x128xf32>
    %c0_3 = arith.constant 0 : index
    %c0_4 = arith.constant 0 : index
    %3 = vector.load %arg3[%c0_3, %c0_4] : memref<1x128xf32, #tpu.memory_space<vmem>>, vector<1x128xf32>
    %4 = vector.broadcast %3 : vector<1x128xf32> to vector<8x128xf32>
    %5 = arith.addf %2, %4 : vector<8x128xf32>
    %cst_5 = arith.constant 0.000000e+00 : f32
    %6 = vector.broadcast %cst_5 : f32 to vector<8x128xf32>
    %7 = arith.maximumf %5, %6 : vector<8x128xf32>
    %c0_6 = arith.constant 0 : index
    %c0_7 = arith.constant 0 : index
    %8 = vector.load %arg4[%c0_6, %c0_7] : memref<128x128xf32, #tpu.memory_space<vmem>>, vector<128x128xf32>
    %cst_8 = arith.constant dense<0.000000e+00> : vector<8x128xf32>
    %9 = tpu.matmul %7, %8, %cst_8 {dimension_numbers = #tpu.dot_dimension_numbers<[1], [0], [0], [1], [0, 0, 1, 1], [], []>} : vector<8x128xf32>, vector<128x128xf32>, vector<8x128xf32> -> vector<8x128xf32>
    %c0_9 = arith.constant 0 : index
    %c0_10 = arith.constant 0 : index
    %10 = vector.load %arg5[%c0_9, %c0_10] : memref<1x128xf32, #tpu.memory_space<vmem>>, vector<1x128xf32>
    %11 = vector.broadcast %10 : vector<1x128xf32> to vector<8x128xf32>
    %12 = arith.addf %9, %11 : vector<8x128xf32>
    %cst_11 = arith.constant 0.000000e+00 : f32
    %13 = vector.broadcast %cst_11 : f32 to vector<8x128xf32>
    %14 = arith.maximumf %12, %13 : vector<8x128xf32>
    %c0_12 = arith.constant 0 : index
    %c0_13 = arith.constant 0 : index
    %15 = vector.load %arg6[%c0_12, %c0_13] : memref<128x128xf32, #tpu.memory_space<vmem>>, vector<128x128xf32>
    %cst_14 = arith.constant dense<0.000000e+00> : vector<8x128xf32>
    %16 = tpu.matmul %14, %15, %cst_14 {dimension_numbers = #tpu.dot_dimension_numbers<[1], [0], [0], [1], [0, 0, 1, 1], [], []>} : vector<8x128xf32>, vector<128x128xf32>, vector<8x128xf32> -> vector<8x128xf32>
    %c0_15 = arith.constant 0 : index
    %c0_16 = arith.constant 0 : index
    %17 = vector.load %arg7[%c0_15, %c0_16] : memref<1x128xf32, #tpu.memory_space<vmem>>, vector<1x128xf32>
    %18 = vector.broadcast %17 : vector<1x128xf32> to vector<8x128xf32>
    %19 = arith.addf %16, %18 : vector<8x128xf32>
    %c0_17 = arith.constant 0 : index
    %c0_18 = arith.constant 0 : index
    %20 = vector.load %arg8[%c0_17, %c0_18] : memref<8x128xf32, #tpu.memory_space<vmem>>, vector<8x128xf32>
    tpu.vector_store %arg8[%c0_17, %c0_18], %19 {strides = array<i32>} : memref<8x128xf32, #tpu.memory_space<vmem>>, vector<8x128xf32>,
    return
  }
  func.func @transform_0(%arg0: i32) -> (i32, i32) {
    %c0_i32 = arith.constant 0 : i32
    %c0_i32_0 = arith.constant 0 : i32
    return %arg0, %c0_i32 : i32, i32
  }
  func.func @transform_1(%arg0: i32) -> (i32, i32) {
    %c0_i32 = arith.constant 0 : i32
    %c0_i32_0 = arith.constant 0 : i32
    %c0_i32_1 = arith.constant 0 : i32
    return %c0_i32, %c0_i32_0 : i32, i32
  }
  func.func @transform_2(%arg0: i32) -> (i32, i32) {
    %c0_i32 = arith.constant 0 : i32
    %c0_i32_0 = arith.constant 0 : i32
    %c0_i32_1 = arith.constant 0 : i32
    return %c0_i32, %c0_i32_0 : i32, i32
  }
  func.func @transform_3(%arg0: i32) -> (i32, i32) {
    %c0_i32 = arith.constant 0 : i32
    %c0_i32_0 = arith.constant 0 : i32
    %c0_i32_1 = arith.constant 0 : i32
    return %c0_i32, %c0_i32_0 : i32, i32
  }
  func.func @transform_4(%arg0: i32) -> (i32, i32) {
    %c0_i32 = arith.constant 0 : i32
    %c0_i32_0 = arith.constant 0 : i32
    %c0_i32_1 = arith.constant 0 : i32
    return %c0_i32, %c0_i32_0 : i32, i32
  }
  func.func @transform_5(%arg0: i32) -> (i32, i32) {
    %c0_i32 = arith.constant 0 : i32
    %c0_i32_0 = arith.constant 0 : i32
    %c0_i32_1 = arith.constant 0 : i32
    return %c0_i32, %c0_i32_0 : i32, i32
  }
  func.func @transform_6(%arg0: i32) -> (i32, i32) {
    %c0_i32 = arith.constant 0 : i32
    %c0_i32_0 = arith.constant 0 : i32
    %c0_i32_1 = arith.constant 0 : i32
    return %c0_i32, %c0_i32_0 : i32, i32
  }
  func.func @transform_7(%arg0: i32) -> (i32, i32) {
    %c0_i32 = arith.constant 0 : i32
    %c0_i32_0 = arith.constant 0 : i32
    return %arg0, %c0_i32 : i32, i32
  }
}

</mosaic_0001>

<bundles_post_ra>
// kernel: tpu_custom_call.1
= control target key start
LH: loop header
LB: loop body
LE: loop exit
PB: predicated region body
PF: predicated region fallthrough
CT: control target
= control target key end

     0   :  { %12 = vsyncpa [#allocation3], 0  ;;  %s437_s0 = inlined_call_operand.hbm [shape: f32[8,64], index: 0, kind: input, shape index: {}]   ;;  %s438_s1 = inlined_call_operand.hbm [shape: f32[64,128], index: 1, kind: input, shape index: {}]   ;;  %s439_s2 = inlined_call_operand.vmem [shape: f32[1,128], index: 2, kind: input, shape index: {}]   ;;  %s440_s3 = inlined_call_operand.hbm [shape: f32[128,128], index: 3, kind: input, shape index: {}]   ;;  %s441_s4 = inlined_call_operand.vmem [shape: f32[1,128], index: 4, kind: input, shape index: {}]   ;;  %s442_s5 = inlined_call_operand.hbm [shape: f32[128,128], index: 5, kind: input, shape index: {}]   ;;  %s443_s6 = inlined_call_operand.vmem [shape: f32[1,128], index: 6, kind: input, shape index: {}]   ;;  %s444_s7 = inlined_call_operand.hbm [shape: f32[8,128], index: 7, kind: output, shape index: {}]  }
   0x1   :  { %13 = vsyncpa [#allocation6], 0 }
   0x2   :  { %14 = vsyncpa [#allocation9], 0  ;;  %s31_s26 = sshll.u32 %s438_s1, 4  ;;  %s32_s26 = int_to_ptr.hbm [resolvable:$true] %s31_s26 }
   0x3   :  { %15 = vsyncpa [#allocation4], 0  ;;  %s366_s27 = smov [#allocation5]   ;;  %s21_s8 = sshll.u32 %s437_s0, 4  ;;  %s22_s8 = int_to_ptr.hbm [resolvable:$true] %s21_s8 }
   0x4   :  { %s33_s28 = sshll.u32 %s366_s27, 4  ;;  %s367_s9 = smov 128   ;;  %s34_s28 = int_to_ptr.vmem [resolvable:$true] %s33_s28 }
   0x5   :  { %s368_s10 = smov 8   ;;  %s369_s11 = smov [#allocation2]  }
   0x6   :  { %39 = dma.hbm_to_vmem [thread:$0]  %s32_s26, 1024, %s34_s28, [#allocation6], %s367_s9, %s367_s9, %s368_s10  }
   0x7   :  { %s23_s12 = sshll.u32 %s369_s11, 4  ;;  %s46_s15 = sshll.u32 %s440_s3, 4  ;;  %s24_s12 = int_to_ptr.vmem [resolvable:$true] %s23_s12  ;;  %s47_s15 = int_to_ptr.hbm [resolvable:$true] %s46_s15 }
   0x8   :  { %26 = dma.hbm_to_vmem [thread:$0]  %s22_s8, 128, %s24_s12, [#allocation3]  }
   0x9   :  { %s61_s17 = sshll.u32 %s442_s5, 4  ;;  %s370_s18 = smov [#allocation7]   ;;  %s62_s17 = int_to_ptr.hbm [resolvable:$true] %s61_s17 }
   0xa   :  { %s48_s19 = sshll.u32 %s370_s18, 4  ;;  %s371_s0 = smov [#allocation8]   ;;  %s49_s19 = int_to_ptr.vmem [resolvable:$true] %s48_s19 }
   0xb   :  { %54 = dma.hbm_to_vmem [thread:$0]  %s47_s15, 2048, %s49_s19, [#allocation6], %s367_s9, %s367_s9, %s368_s10  }
   0xc   :  { %s63_s20 = sshll.u32 %s371_s0, 4  ;;  %s64_s20 = int_to_ptr.vmem [resolvable:$true] %s63_s20 }
   0xd   :  { %69 = dma.hbm_to_vmem [thread:$0]  %s62_s17, 2048, %s64_s20, [#allocation9], %s367_s9, %s367_s9, %s368_s10  }
   0xe   :  { %358 = dma.done.wait [#allocation3], 128  }
   0xf   :  { %359 = vsyncadd [#allocation3], 4294967168 }
  0x10   :  { %360 = dma.done.wait [#allocation6], 3072  }
  0x11   :  { %361 = vsyncadd [#allocation6], 4294964224 }
  0x12   :  { %362 = dma.done.wait [#allocation9], 2048  }
  0x13   :  { %363 = vsyncadd [#allocation9], 4294965248  ;;  %v96_v0 = vld [vmem:[#allocation5 + $0x38] sm:$0xff]  ;;  %v95_v1 = vld [vmem:[#allocation5 + $0x30] sm:$0xff]  ;;  %vm101_vm0 = vcmask 523264   ;;  %s372_s24 = smov [#allocation10]  }
  0x14   :  { %113 = vmatpush.msra.mxu0 %v96_v0  ;;  %v94_v2 = vld [vmem:[#allocation5 + $0x28] sm:$0xff]  ;;  %v141_v3 = vld [vmem:[#allocation7 + $0x78] sm:$0xff]  ;;  %v140_v4 = vld [vmem:[#allocation7 + $0x70] sm:$0xff]  ;;  %s213_s25 = sshll.u32 %s372_s24, 4  ;;  %s215_s28 = sshll.u32 %s444_s7, 4  ;;  %s214_s25 = int_to_ptr.vmem [resolvable:$true] %s213_s25  ;;  %s216_s28 = int_to_ptr.hbm [resolvable:$true] %s215_s28 }
  0x15   :  { %v93_v5 = vld [vmem:[#allocation5 + $0x20] sm:$0xff]  ;;  %146 = vmatpush.msra.mxu1 %v141_v3  ;;  %v139_v6 = vld [vmem:[#allocation7 + $0x68] sm:$0xff]  ;;  %v92_v7 = vld [vmem:[#allocation5 + $0x18] sm:$0xff] }
  0x16   :  { %114 = vmatpush.msra.mxu0 %v95_v1  ;;  %v138_v8 = vld [vmem:[#allocation7 + $0x60] sm:$0xff]  ;;  %v91_v9 = vld [vmem:[#allocation5 + $0x10] sm:$0xff]  ;;  %v137_v10 = vld [vmem:[#allocation7 + $0x58] sm:$0xff] }
  0x17   :  { %147 = vmatpush.msra.mxu1 %v140_v4  ;;  %v90_v11 = vld [vmem:[#allocation5 + $0x8] sm:$0xff]  ;;  %v136_v12 = vld [vmem:[#allocation7 + $0x50] sm:$0xff]  ;;  %v89_v13 = vld [vmem:[#allocation5] sm:$0xff] }
  0x18   :  { %115 = vmatpush.msra.mxu0 %v94_v2  ;;  %v88_v14 = vld [vmem:[#allocation2] sm:$0xff]  ;;  %v135_v15 = vld [vmem:[#allocation7 + $0x48] sm:$0xff]  ;;  %v134_v16 = vld [vmem:[#allocation7 + $0x40] sm:$0xff] }
  0x19   :  { %148 = vmatpush.msra.mxu1 %v139_v6  ;;  %v133_v17 = vld [vmem:[#allocation7 + $0x38] sm:$0xff]  ;;  %v132_v18 = vld [vmem:[#allocation7 + $0x30] sm:$0xff]  ;;  %v131_v19 = vld [vmem:[#allocation7 + $0x28] sm:$0xff] }
  0x1a   :  { %116 = vmatpush.msra.mxu0 %v93_v5  ;;  %v130_v20 = vld [vmem:[#allocation7 + $0x20] sm:$0xff]  ;;  %v129_v21 = vld [vmem:[#allocation7 + $0x18] sm:$0xff]  ;;  %v128_v22 = vld [vmem:[#allocation7 + $0x10] sm:$0xff] }
  0x1b   :  { %149 = vmatpush.msra.mxu1 %v138_v8  ;;  %v127_v23 = vld [vmem:[#allocation7 + $0x8] sm:$0xff]  ;;  %v126_v24 = vld [vmem:[#allocation7] sm:$0xff]  ;;  %v182_v25 = vld [vmem:[#allocation8 + $0x78] sm:$0xff] }
  0x1c   :  { %117 = vmatpush.msra.mxu0 %v92_v7  ;;  %v181_v26 = vld [vmem:[#allocation8 + $0x70] sm:$0xff]  ;;  %187 = vmatpush.msra.mxu2 %v182_v25  ;;  %v180_v27 = vld [vmem:[#allocation8 + $0x68] sm:$0xff]  ;;  %v179_v28 = vld [vmem:[#allocation8 + $0x60] sm:$0xff] }
  0x1d   :  { %150 = vmatpush.msra.mxu1 %v137_v10  ;;  %v178_v29 = vld [vmem:[#allocation8 + $0x58] sm:$0xff]  ;;  %v177_v30 = vld [vmem:[#allocation8 + $0x50] sm:$0xff]  ;;  %v176_v31 = vld [vmem:[#allocation8 + $0x48] sm:$0xff] }
  0x1e   :  { %118 = vmatpush.msra.mxu0 %v91_v9  ;;  %188 = vmatpush.msra.mxu2 %v181_v26  ;;  %v175_v32 = vld [vmem:[#allocation8 + $0x40] sm:$0xff]  ;;  %v174_v33 = vld [vmem:[#allocation8 + $0x38] sm:$0xff]  ;;  %v173_v34 = vld [vmem:[#allocation8 + $0x30] sm:$0xff] }
  0x1f   :  { %151 = vmatpush.msra.mxu1 %v136_v12  ;;  %v172_v35 = vld [vmem:[#allocation8 + $0x28] sm:$0xff]  ;;  %v171_v36 = vld [vmem:[#allocation8 + $0x20] sm:$0xff]  ;;  %v170_v37 = vld [vmem:[#allocation8 + $0x18] sm:$0xff] }
  0x20   :  { %119 = vmatpush.msra.mxu0 %v90_v11  ;;  %189 = vmatpush.msra.mxu2 %v180_v27  ;;  %v235_v38 = vld [vmem:[%s439_s2] ss:$0 sm:$0xff]  ;;  %v169_v42 = vld [vmem:[#allocation8 + $0x10] sm:$0xff]  ;;  %v168_v43 = vld [vmem:[#allocation8 + $0x8] sm:$0xff] }
  0x21   :  { %152 = vmatpush.msra.mxu1 %v135_v15  ;;  %v167_v44 = vld [vmem:[#allocation8] sm:$0xff]  ;;  %v236_v45 = vld [vmem:[%s441_s4] ss:$0 sm:$0xff] }
  0x22   :  { %120 = vmatpush.msra.mxu0 %v89_v13  ;;  %190 = vmatpush.msra.mxu2 %v179_v28  ;;  %v237_v49 = vld [vmem:[%s443_s6] ss:$0 sm:$0xff] }
  0x23   :  { %227 = vmatmul.msk.f32.vlgmr.msra.gmra.mxu0 %vm101_vm0, %v88_v14  ;;  %153 = vmatpush.msra.mxu1 %v134_v16 }
  0x24   :  { %191 = vmatpush.msra.mxu2 %v178_v29 }
  0x25   :  { %154 = vmatpush.msra.mxu1 %v133_v17 }
  0x26   :  { %192 = vmatpush.msra.mxu2 %v177_v30 }
  0x27   :  { %155 = vmatpush.msra.mxu1 %v132_v18 }
  0x28   :  { %193 = vmatpush.msra.mxu2 %v176_v31 }
  0x29   :  { %156 = vmatpush.msra.mxu1 %v131_v19 }
  0x2a   :  { %194 = vmatpush.msra.mxu2 %v175_v32 }
  0x2b   :  { %157 = vmatpush.msra.mxu1 %v130_v20 }
  0x2c   :  { %195 = vmatpush.msra.mxu2 %v174_v33 }
  0x2d   :  { %158 = vmatpush.msra.mxu1 %v129_v21 }
  0x2e   :  { %196 = vmatpush.msra.mxu2 %v173_v34 }
  0x2f   :  { %159 = vmatpush.msra.mxu1 %v128_v22 }
  0x30   :  { %197 = vmatpush.msra.mxu2 %v172_v35 }
  0x31   :  { %160 = vmatpush.msra.mxu1 %v127_v23 }
  0x32   :  { %198 = vmatpush.msra.mxu2 %v171_v36 }
  0x33   :  { %161 = vmatpush.msra.mxu1 %v126_v24 }
  0x34   :  { %199 = vmatpush.msra.mxu2 %v170_v37 }
  0x36   :  { %200 = vmatpush.msra.mxu2 %v169_v42 }
  0x38   :  { %201 = vmatpush.msra.mxu2 %v168_v43 }
  0x3a   :  { %202 = vmatpush.msra.mxu2 %v167_v44 }
  0xa0   :  { %v122_v39 = vpop.f32.mrf.mxu0 }
  0xa1   :  { %v123_v40 = vadd.f32 %v235_v38, %v122_v39 }
  0xa3   :  { %v125_v41 = vmax.f32 %v123_v40, 0.0 }
  0xa5   :  { %162 = vmatmul.f32.vlgmr.msra.gmra.mxu1 %v125_v41 }
 0x122   :  { %v163_v46 = vpop.f32.mrf.mxu1 }
 0x123   :  { %v164_v47 = vadd.f32 %v236_v45, %v163_v46 }
 0x125   :  { %v166_v48 = vmax.f32 %v164_v47, 0.0 }
 0x127   :  { %203 = vmatmul.f32.vlgmr.msra.gmra.mxu2 %v166_v48 }
 0x1aa   :  { %v204_v50 = vpop.f32.mrf.mxu2 }
 0x1ab   :  { %v205_v51 = vadd.f32 %v237_v49, %v204_v50 }
 0x1ad   :  { %207 = vst [vmem:[#allocation10] sm:$0xff] %v205_v51 }
 0x1ae   :  { %218 = dma.vmem_to_hbm [thread:$0]  %s214_s25, 128, %s216_s28, [#allocation4]  }
 0x1af   :  { %364 = dma.done.wait [#allocation4], 128  }
 0x1b0   :  { %365 = vsyncadd [#allocation4], 4294967168 }
 0x1b1   :  { %223 = vsyncpa [#allocation3], 1 }
 0x1b2   :  { %224 = vsyncpa [#allocation6], 1 }
 0x1b3   :  { %225 = vsyncpa [#allocation9], 1 }
 0x1b4   :  { %226 = vsyncpa [#allocation4], 1 }

</bundles_post_ra>
